<compile_context>
chip_gen: v7x
topology: tpu7x:2x2x1
jax: 0.10.0
libtpu: 0.0.40
codegen_flags: <defaults>
</compile_context>

<pallas_src>
import functools
import math

import jax
import jax.numpy as jnp
from jax.experimental import pallas as pl
from jax.experimental.pallas import tpu as pltpu


def _lambda_pair_kernel(s_ref, t_ref, sum_ref, cnt_ref, *, eps, sigma,
                        reduction_log):
    """Pairwise LambdaLoss partials for one block of BT slates.

    s_ref  : (BT, K) y_pred sorted descending (top-k slice)
    t_ref  : (BT, K) y_true gathered by prediction order (top-k slice)
    sum_ref: (1, 1, 1) this block's sum of masked log-losses
    cnt_ref: (1, 1, 1) this block's count of valid pairs
    """
    s = s_ref[...]                                       # (BT, K)
    t = t_ref[...]                                       # (BT, K)

    # Pairwise label diffs + validity mask (un-clamped labels, as in PyTorch).
    true_diffs = t[:, :, None] - t[:, None, :]           # (BT, K, K)
    pair_mask = (jnp.abs(true_diffs) < jnp.inf) & (true_diffs >= 0.0)

    # Pairwise score diffs -> fused, eps-floored log-sigmoid.
    x = s[:, :, None] - s[:, None, :]                    # (BT, K, K)
    if sigma != 1.0:                                     # static Python branch
        x = x * sigma
    # log(max(sigmoid(x), eps)) == max(min(x, 0) - log(1 + exp(-|x|)), log(eps))
    log_sig = jnp.minimum(x, 0.0) - jnp.log(1.0 + jnp.exp(-jnp.abs(x)))
    losses = jnp.maximum(log_sig, math.log(eps))
    if reduction_log == "binary":                        # static Python branch
        losses = losses * (1.0 / math.log(2.0))

    masked = jnp.where(pair_mask, losses, 0.0)
    sum_ref[...] = jnp.sum(masked)[None, None, None]
    cnt_ref[...] = jnp.sum(pair_mask.astype(jnp.float32))[None, None, None]


def _choose_block_batch(b, k, vmem_budget_bytes=4 << 20):
    """How many slates per grid step.

    Keeps the ~6 live f32 (BT, K, K) intermediates within a small VMEM budget
    (safe for the default scoped-VMEM limit on v5e/v6e/v7x) while making each
    step large enough to amortise per-step pipeline overhead.
    """
    per_slate = 6 * k * k * 4
    bt = max(1, vmem_budget_bytes // per_slate)
    bt = int(min(bt, b))
    if bt < b:
        # Multiple batch blocks -> keep second-to-last block dim a multiple of 8.
        bt = max(8, (bt // 8) * 8)
    # TODO(synk): for very long slates (k in the thousands) the (K, K) pairwise
    # matrix itself should be 2D-tiled with an accumulator instead of relying
    # on a small batch tile.
    return bt


def lambda_loss_pallas(y_pred, y_true, *, eps=1e-10, padded_value_indicator=-1.0,
                       k=None, sigma=1.0, reduction="mean",
                       reduction_log="binary"):
    """LambdaLoss forward (weighing_scheme=None); pairwise hot path in Pallas."""
    if reduction not in ("mean", "sum"):
        raise ValueError("Reduction method can be either sum or mean")
    if reduction_log not in ("natural", "binary"):
        raise ValueError("Reduction logarithm base can be either natural or binary")

    y_pred = y_pred.astype(jnp.float32)
    y_true = y_true.astype(jnp.float32)
    b, n = y_pred.shape
    k = min(k or n, n)

    # ---- plain-XLA glue (mirrors the PyTorch preamble op-for-op) -----------
    y_true_t = jnp.max(y_true) - y_true + jnp.min(y_true)
    padded_mask = y_true_t == padded_value_indicator
    y_pred_m = jnp.where(padded_mask, -jnp.inf, y_pred)
    y_true_m = jnp.where(padded_mask, -jnp.inf, y_true_t)

    # TODO(synk): sort/argsort has no clean Pallas TPU equivalent; done in XLA.
    order = jnp.argsort(-y_pred_m, axis=-1)                       # descending
    y_pred_sorted = jnp.take_along_axis(y_pred_m, order, axis=-1)
    true_sorted_by_preds = jnp.take_along_axis(y_true_m, order, axis=-1)
    # (maxDCGs / G / D are dead code when weighing_scheme is None; skipped.)

    # ndcg@k mask == restrict rows and cols to the first k sorted positions,
    # so simply slice the top-k corner instead of masking in-kernel.
    s = y_pred_sorted[:, :k]                                      # (b, K)
    t = true_sorted_by_preds[:, :k]                               # (b, K)

    bt = _choose_block_batch(b, k)
    nb = pl.cdiv(b, bt)
    bp = nb * bt
    if bp != b:
        # Pad: scores with 0.0 (harmless), labels with -inf so every pair of a
        # padded slate fails the finiteness mask and contributes nothing.
        s = jnp.pad(s, ((0, bp - b), (0, 0)), constant_values=0.0)
        t = jnp.pad(t, ((0, bp - b), (0, 0)), constant_values=-jnp.inf)

    kernel = functools.partial(_lambda_pair_kernel, eps=eps, sigma=sigma,
                               reduction_log=reduction_log)

    in_spec = pl.BlockSpec((bt, k), lambda i: (i, 0))
    out_spec = pl.BlockSpec((1, 1, 1), lambda i: (i, 0, 0))

    psum, pcnt = pl.pallas_call(
        kernel,
        grid=(nb,),
        in_specs=[in_spec, in_spec],
        out_specs=[out_spec, out_spec],
        out_shape=[jax.ShapeDtypeStruct((nb, 1, 1), jnp.float32),
                   jax.ShapeDtypeStruct((nb, 1, 1), jnp.float32)],
        compiler_params=pltpu.CompilerParams(
            dimension_semantics=("parallel",)),
    )(s, t)

    total = jnp.sum(psum)
    count = jnp.sum(pcnt)
    if reduction == "mean":
        return -(total / count)
    return -total


def lambda_loss_reference(y_pred, y_true, *, eps=1e-10,
                          padded_value_indicator=-1.0, k=None, sigma=1.0,
                          reduction="mean", reduction_log="binary"):
    """Pure-JAX mirror of the PyTorch forward (weighing_scheme=None)."""
    y_pred = y_pred.astype(jnp.float32)
    y_true = y_true.astype(jnp.float32)
    n = y_true.shape[1]
    k = min(k or n, n)
    y_true_t = jnp.max(y_true) - y_true + jnp.min(y_true)
    padded_mask = y_true_t == padded_value_indicator
    y_pred_m = jnp.where(padded_mask, -jnp.inf, y_pred)
    y_true_m = jnp.where(padded_mask, -jnp.inf, y_true_t)
    order = jnp.argsort(-y_pred_m, axis=-1)
    yps = jnp.take_along_axis(y_pred_m, order, axis=-1)
    tsp = jnp.take_along_axis(y_true_m, order, axis=-1)
    true_diffs = tsp[:, :, None] - tsp[:, None, :]
    pair_mask = jnp.isfinite(true_diffs) & (true_diffs >= 0)
    at_k = (jnp.arange(n)[:, None] < k) & (jnp.arange(n)[None, :] < k)
    pair_mask = pair_mask & at_k[None]
    sd = jnp.clip(yps[:, :, None] - yps[:, None, :], -1e8, 1e8)
    probas = jnp.maximum(jax.nn.sigmoid(sigma * sd), eps)
    losses = jnp.log(probas) if reduction_log == "natural" else jnp.log2(probas)
    masked = jnp.where(pair_mask, losses, 0.0)
    if reduction == "mean":
        return -(jnp.sum(masked) / jnp.sum(pair_mask))
    return -jnp.sum(masked)


if __name__ == "__main__":
    key = jax.random.PRNGKey(0)
    k_pred, k_true = jax.random.split(key)
    B, N = 4, 16  # batch of 4 slates, 16 documents each

    y_pred = jax.random.normal(k_pred, (B, N), dtype=jnp.float32)
    # Integer-valued relevance labels 0..4 (typical LTR labels).
    y_true = jax.random.randint(k_true, (B, N), 0, 5).astype(jnp.float32)

    loss = jax.block_until_ready(lambda_loss_pallas(y_pred, y_true))
    ref = jax.block_until_ready(lambda_loss_reference(y_pred, y_true))
    assert jnp.isfinite(loss), f"non-finite loss: {loss}"
    assert jnp.allclose(loss, ref, rtol=1e-5, atol=1e-5), (loss, ref)

    # Exercise the top-k slicing and sum / natural-log paths too.
    loss_k = jax.block_until_ready(
        lambda_loss_pallas(y_pred, y_true, k=8, reduction="sum",
                           reduction_log="natural"))
    ref_k = jax.block_until_ready(
        lambda_loss_reference(y_pred, y_true, k=8, reduction="sum",
                              reduction_log="natural"))
    assert jnp.allclose(loss_k, ref_k, rtol=1e-5, atol=1e-5), (loss_k, ref_k)

    print("KERNEL_OK")
</pallas_src>

<mosaic_0001>
module attributes {stable_mosaic.version = 11 : i64} {
  func.func @_lambda_pair_kernel(%arg0: i32, %arg1: memref<4x16xf32, #tpu.memory_space<vmem>>, %arg2: memref<4x16xf32, #tpu.memory_space<vmem>>, %arg3: memref<1x1x1xf32, #tpu.memory_space<vmem>>, %arg4: memref<1x1x1xf32, #tpu.memory_space<vmem>>) attributes {dimension_semantics = [#tpu.dimension_semantics<parallel>], iteration_bounds = array<i64: 1>, scalar_prefetch = 0 : i64, scratch_operands = 0 : i64, tpu.core_type = #tpu.core_type<tc>, window_params = [{transform_indices = @transform_0, window_bounds = array<i64: 4, 16>}, {transform_indices = @transform_1, window_bounds = array<i64: 4, 16>}, {transform_indices = @transform_2, window_bounds = array<i64: 1, 1, 1>}, {transform_indices = @transform_3, window_bounds = array<i64: 1, 1, 1>}]} {
    %c0 = arith.constant 0 : index
    %c0_0 = arith.constant 0 : index
    %0 = vector.load %arg1[%c0, %c0_0] : memref<4x16xf32, #tpu.memory_space<vmem>>, vector<4x16xf32>
    %c0_1 = arith.constant 0 : index
    %c0_2 = arith.constant 0 : index
    %1 = vector.load %arg2[%c0_1, %c0_2] : memref<4x16xf32, #tpu.memory_space<vmem>>, vector<4x16xf32>
    %2 = vector.shape_cast %1 : vector<4x16xf32> to vector<4x16x1xf32>
    %3 = vector.shape_cast %1 : vector<4x16xf32> to vector<4x1x16xf32>
    %4 = vector.broadcast %2 : vector<4x16x1xf32> to vector<4x16x16xf32>
    %5 = vector.broadcast %3 : vector<4x1x16xf32> to vector<4x16x16xf32>
    %6 = arith.subf %4, %5 : vector<4x16x16xf32>
    %7 = math.absf %6 : vector<4x16x16xf32>
    %cst = arith.constant 0x7F800000 : f32
    %8 = vector.broadcast %cst : f32 to vector<4x16x16xf32>
    %9 = arith.cmpf olt, %7, %8 : vector<4x16x16xf32>
    %cst_3 = arith.constant 0.000000e+00 : f32
    %10 = vector.broadcast %cst_3 : f32 to vector<4x16x16xf32>
    %11 = arith.cmpf oge, %6, %10 : vector<4x16x16xf32>
    %12 = arith.andi %9, %11 : vector<4x16x16xi1>
    %13 = vector.shape_cast %0 : vector<4x16xf32> to vector<4x16x1xf32>
    %14 = vector.shape_cast %0 : vector<4x16xf32> to vector<4x1x16xf32>
    %15 = vector.broadcast %13 : vector<4x16x1xf32> to vector<4x16x16xf32>
    %16 = vector.broadcast %14 : vector<4x1x16xf32> to vector<4x16x16xf32>
    %17 = arith.subf %15, %16 : vector<4x16x16xf32>
    %cst_4 = arith.constant 0.000000e+00 : f32
    %18 = vector.broadcast %cst_4 : f32 to vector<4x16x16xf32>
    %19 = arith.minimumf %17, %18 : vector<4x16x16xf32>
    %20 = math.absf %17 : vector<4x16x16xf32>
    %cst_5 = arith.constant 0.000000e+00 : f32
    %21 = vector.broadcast %cst_5 : f32 to vector<4x16x16xf32>
    %22 = arith.subf %21, %20 : vector<4x16x16xf32>
    %23 = math.exp %22 : vector<4x16x16xf32>
    %cst_6 = arith.constant 1.000000e+00 : f32
    %24 = vector.broadcast %cst_6 : f32 to vector<4x16x16xf32>
    %25 = arith.addf %24, %23 : vector<4x16x16xf32>
    %26 = math.log %25 : vector<4x16x16xf32>
    %27 = arith.subf %19, %26 : vector<4x16x16xf32>
    %cst_7 = arith.constant -23.0258503 : f32
    %28 = vector.broadcast %cst_7 : f32 to vector<4x16x16xf32>
    %29 = arith.maximumf %27, %28 : vector<4x16x16xf32>
    %cst_8 = arith.constant 1.44269502 : f32
    %30 = vector.broadcast %cst_8 : f32 to vector<4x16x16xf32>
    %31 = arith.mulf %29, %30 : vector<4x16x16xf32>
    %cst_9 = arith.constant 0.000000e+00 : f32
    %32 = vector.broadcast %cst_9 : f32 to vector<4x16x16xf32>
    %33 = arith.select %12, %31, %32 : vector<4x16x16xi1>, vector<4x16x16xf32>
    %34 = vector.shape_cast %33 : vector<4x16x16xf32> to vector<1x4x16x16xf32>
    %cst_10 = arith.constant dense<0.000000e+00> : vector<1xf32>
    %35 = vector.multi_reduction <add>, %34, %cst_10 [1, 2, 3] : vector<1x4x16x16xf32> to vector<1xf32>
    %36 = vector.shape_cast %35 : vector<1xf32> to vector<1x1x1x1xf32>
    %37 = vector.extract %36[0, 0, 0, 0] : f32 from vector<1x1x1x1xf32>
    %38 = vector.broadcast %37 : f32 to vector<1x1x1xf32>
    %c0_11 = arith.constant 0 : index
    %c0_12 = arith.constant 0 : index
    %c0_13 = arith.constant 0 : index
    %39 = vector.load %arg3[%c0_11, %c0_12, %c0_13] : memref<1x1x1xf32, #tpu.memory_space<vmem>>, vector<1x1x1xf32>
    tpu.vector_store %arg3[%c0_11, %c0_12, %c0_13], %38 {strides = array<i32>} : memref<1x1x1xf32, #tpu.memory_space<vmem>>, vector<1x1x1xf32>,
    %40 = arith.extui %12 : vector<4x16x16xi1> to vector<4x16x16xi32>
    %41 = arith.sitofp %40 : vector<4x16x16xi32> to vector<4x16x16xf32>
    %42 = vector.shape_cast %41 : vector<4x16x16xf32> to vector<1x4x16x16xf32>
    %cst_14 = arith.constant dense<0.000000e+00> : vector<1xf32>
    %43 = vector.multi_reduction <add>, %42, %cst_14 [1, 2, 3] : vector<1x4x16x16xf32> to vector<1xf32>
    %44 = vector.shape_cast %43 : vector<1xf32> to vector<1x1x1x1xf32>
    %45 = vector.extract %44[0, 0, 0, 0] : f32 from vector<1x1x1x1xf32>
    %46 = vector.broadcast %45 : f32 to vector<1x1x1xf32>
    %c0_15 = arith.constant 0 : index
    %c0_16 = arith.constant 0 : index
    %c0_17 = arith.constant 0 : index
    %47 = vector.load %arg4[%c0_15, %c0_16, %c0_17] : memref<1x1x1xf32, #tpu.memory_space<vmem>>, vector<1x1x1xf32>
    tpu.vector_store %arg4[%c0_15, %c0_16, %c0_17], %46 {strides = array<i32>} : memref<1x1x1xf32, #tpu.memory_space<vmem>>, vector<1x1x1xf32>,
    return
  }
  func.func @transform_0(%arg0: i32) -> (i32, i32) {
    %c0_i32 = arith.constant 0 : i32
    %c0_i32_0 = arith.constant 0 : i32
    return %arg0, %c0_i32 : i32, i32
  }
  func.func @transform_1(%arg0: i32) -> (i32, i32) {
    %c0_i32 = arith.constant 0 : i32
    %c0_i32_0 = arith.constant 0 : i32
    return %arg0, %c0_i32 : i32, i32
  }
  func.func @transform_2(%arg0: i32) -> (i32, i32, i32) {
    %c0_i32 = arith.constant 0 : i32
    %c0_i32_0 = arith.constant 0 : i32
    %c0_i32_1 = arith.constant 0 : i32
    return %arg0, %c0_i32, %c0_i32_0 : i32, i32, i32
  }
  func.func @transform_3(%arg0: i32) -> (i32, i32, i32) {
    %c0_i32 = arith.constant 0 : i32
    %c0_i32_0 = arith.constant 0 : i32
    %c0_i32_1 = arith.constant 0 : i32
    return %arg0, %c0_i32, %c0_i32_0 : i32, i32, i32
  }
}

</mosaic_0001>

<bundles_post_ra>
// kernel: tpu_custom_call.1
= control target key start
LH: loop header
LB: loop body
LE: loop exit
PB: predicated region body
PF: predicated region fallthrough
CT: control target
= control target key end

     0   :  { %9 = vsyncpa [#allocation3], 0  ;;  %s833_s0 = inlined_call_operand.hbm [shape: f32[4,16], index: 0, kind: input, shape index: {}]   ;;  %s834_s1 = inlined_call_operand.hbm [shape: f32[4,16], index: 1, kind: input, shape index: {}]   ;;  %s835_s2 = inlined_call_operand.hbm [shape: f32[1,1,1], index: 2, kind: output, shape index: {0}]   ;;  %s836_s3 = inlined_call_operand.hbm [shape: f32[1,1,1], index: 3, kind: output, shape index: {1}]  }
   0x1   :  { %10 = vsyncpa [#allocation6], 0 }
   0x2   :  { %11 = vsyncpa [#allocation4], 0 }
   0x3   :  { %12 = vsyncpa [#allocation9], 0  ;;  %s609_s12 = smov [#allocation2]   ;;  %s610_s14 = smov [#allocation5]  }
   0x4   :  { %s19_s13 = sshll.u32 %s609_s12, 4  ;;  %s29_s15 = sshll.u32 %s610_s14, 4  ;;  %s20_s13 = int_to_ptr.vmem [resolvable:$true] %s19_s13  ;;  %s30_s15 = int_to_ptr.vmem [resolvable:$true] %s29_s15 }
   0x5   :  { %s513_s18 = scalar_lea.hbm %s833_s0, 64 }
   0x6   :  { %p514_p0 = scmp.ne.s32.totalorder %s833_s0, %s513_s18  ;;  %p517_p1 = scmp.lt.u32.totalorder %s513_s18, %s833_s0 }
   0x8   :  { %p519_p2 = pnand %p517_p1, %p514_p0 }
   0xa   :  { %522 = shalt.err (!%p519_p2)
}
   0xb   :  { %s523_s23 = scalar_lea.vmem %s20_s13, 64  ;;  %p528_p4 = scmp.lt.s32.totalorder %s20_s13, %s20_s13 }
   0xc   :  { %p524_p3 = scmp.ne.s32.totalorder %s20_s13, %s523_s23  ;;  %p529_p5 = scmp.lt.s32.totalorder %s523_s23, %s523_s23 }
   0xe   :  { %p530_p6 = por %p529_p5, %p528_p4 }
  0x10   :  { %p531_p7 = pnand %p530_p6, %p524_p3 }
  0x12   :  { %534 = shalt.err (!%p531_p7)
}
  0x13   :  { %22 = dma.hbm_to_vmem [thread:$0]  %s833_s0, 64, %s20_s13, [#allocation3]  }
  0x14   :  { %s535_s28 = scalar_lea.hbm %s834_s1, 64 }
  0x15   :  { %p536_p8 = scmp.ne.s32.totalorder %s834_s1, %s535_s28  ;;  %p539_p9 = scmp.lt.u32.totalorder %s535_s28, %s834_s1 }
  0x17   :  { %p541_p10 = pnand %p539_p9, %p536_p8 }
  0x19   :  { %544 = shalt.err (!%p541_p10)
}
  0x1a   :  { %s545_s6 = scalar_lea.vmem %s30_s15, 64  ;;  %p550_p12 = scmp.lt.s32.totalorder %s30_s15, %s30_s15 }
  0x1b   :  { %p546_p11 = scmp.ne.s32.totalorder %s30_s15, %s545_s6  ;;  %p551_p13 = scmp.lt.s32.totalorder %s545_s6, %s545_s6 }
  0x1d   :  { %p552_p0 = por %p551_p13, %p550_p12 }
  0x1f   :  { %p553_p1 = pnand %p552_p0, %p546_p11 }
  0x21   :  { %556 = shalt.err (!%p553_p1)
}
  0x22   :  { %32 = dma.hbm_to_vmem [thread:$0]  %s834_s1, 64, %s30_s15, [#allocation6]  }
  0x23   :  { %601 = dma.done.wait [#allocation3], 64  }
  0x24   :  { %602 = vsyncadd [#allocation3], 4294967232 }
  0x25   :  { %603 = dma.done.wait [#allocation6], 64  }
  0x26   :  { %604 = vsyncadd [#allocation6], 4294967232  ;;  %v41_v0 = vlaneseq  ;;  %v611_v1 = vmov 1966171168   ;;  %v39_v8 = vld [vmem:[#allocation2] sm:$0xf] }
  0x27   :  { %v87_v2 = vunpack.c.l.s4 %v611_v1  ;;  %v40_v25 = vld [vmem:[#allocation5] sm:$0xf]  ;;  %vm363_vm0 = vcmask 130048   ;;  %s613_s1 = smov [#allocation7]   ;;  %s614_s9 = smov [#allocation8]  }
  0x28   :  { %v42_v3 = vshrl.u32 %v41_v0, 7  ;;  %s439_s8 = sshll.u32 %s613_s1, 4  ;;  %s449_s10 = sshll.u32 %s614_s9, 4  ;;  %s440_s8 = int_to_ptr.vmem [resolvable:$true] %s439_s8  ;;  %s799_s10 = int_to_ptr.vmem [resolvable:$true] %s449_s10 }
  0x29   :  { %v88_v4 = vunpack.c.0.s8 %v87_v2  ;;  %s557_s13 = scalar_lea.vmem %s440_s8, 16  ;;  %s561_s14 = scalar_lea.vmem %s440_s8, 32 }
  0x2a   :  { %v43_v5 = vsub.s32 0, %v42_v3  ;;  %v54_v6 = vsub.s32 1, %v42_v3  ;;  %v65_v11 = vsub.s32 2, %v42_v3  ;;  %v76_v16 = vsub.s32 3, %v42_v3  ;;  %p558_p2 = scmp.ne.s32.totalorder %s440_s8, %s557_s13  ;;  %p562_p3 = scmp.lt.s32.totalorder %s440_s8, %s440_s8 }
  0x2b   :  { %v91_v7 = vsub.s32 %v88_v4, %v42_v3  ;;  %p563_p4 = scmp.lt.s32.totalorder %s561_s14, %s557_s13 }
  0x2c   :  { %v184_v9 = vrot.slane %v39_v8, %v54_v6  ;;  %v173_v10 = vrot.slane %v39_v8, %v43_v5  ;;  %v195_v15 = vrot.slane %v39_v8, %v65_v11  ;;  %v206_v23 = vrot.slane %v39_v8, %v76_v16 }
  0x2d   :  { %v221_v12 = vrot.slane %v39_v8, %v91_v7  ;;  %v44_v26 = vrot.slane %v40_v25, %v43_v5  ;;  %v92_v27 = vrot.slane %v40_v25, %v91_v7  ;;  %v55_v30 = vrot.slane %v40_v25, %v54_v6  ;;  %p564_p5 = por %p563_p4, %p562_p3 }
  0x2e   :  { %186 = vbcast.lane.b32.xlu1 %v184_v9, 256  ;;  %175 = vbcast.lane.b32.xlu0 %v173_v10, 256  ;;  %v66_v34 = vrot.slane %v40_v25, %v65_v11  ;;  %v77_v37 = vrot.slane %v40_v25, %v76_v16 }
  0x2f   :  { %v222_v13 = vcombine.high %v221_v12, %v221_v12  ;;  %v229_v14 = vrot.slane %v221_v12, %v91_v7  ;;  %v100_v28 = vrot.slane %v92_v27, %v91_v7  ;;  %v93_v29 = vcombine.high %v92_v27, %v92_v27  ;;  %p565_p6 = pnand %p564_p5, %p558_p2 }
  0x31   :  { %v236_v17 = vrot.slane %v222_v13, %v91_v7  ;;  %v242_v18 = vrot.slane %v229_v14, %v43_v5  ;;  %v237_v19 = vcombine.high %v229_v14, %v229_v14  ;;  %v113_v31 = vrot.slane %v100_v28, %v43_v5 }
  0x32   :  { %190 = vbcast.lane.b32.xlu1 %v184_v9, 264  ;;  %179 = vbcast.lane.b32.xlu0 %v173_v10, 264  ;;  %v107_v32 = vrot.slane %v93_v29, %v91_v7  ;;  %v108_v35 = vcombine.high %v100_v28, %v100_v28 }
  0x33   :  { %v246_v20 = vrot.slane %v236_v17, %v43_v5  ;;  %v250_v21 = vrot.slane %v237_v19, %v43_v5  ;;  %v238_v22 = vcombine.high %v236_v17, %v236_v17 }
  0x34   :  { %v659_v33 = vrot.slane %v107_v32, %v43_v5  ;;  %v661_v36 = vrot.slane %v108_v35, %v43_v5  ;;  %v109_v38 = vcombine.high %v107_v32, %v107_v32 }
  0x35   :  { %v254_v24 = vrot.slane %v238_v22, %v43_v5 }
  0x36   :  { %201 = vbcast.lane.b32.xlu1 %v195_v15, 264  ;;  %197 = vbcast.lane.b32.xlu0 %v195_v15, 256  ;;  %v663_v39 = vrot.slane %v109_v38, %v43_v5 }
  0x3a   :  { %212 = vbcast.lane.b32.xlu1 %v206_v23, 264  ;;  %208 = vbcast.lane.b32.xlu0 %v206_v23, 256 }
  0x3e   :  { %46 = vbcast.lane.b32.xlu0 %v44_v26, 256  ;;  %50 = vbcast.lane.b32.xlu1 %v44_v26, 264 }
  0x42   :  { %57 = vbcast.lane.b32.xlu0 %v55_v30, 256  ;;  %61 = vbcast.lane.b32.xlu1 %v55_v30, 264 }
  0x46   :  { %68 = vbcast.lane.b32.xlu0 %v66_v34, 256  ;;  %72 = vbcast.lane.b32.xlu1 %v66_v34, 264  ;;  %v612_v34 = vmov 0.0  }
  0x4a   :  { %79 = vbcast.lane.b32.xlu0 %v77_v37, 256  ;;  %83 = vbcast.lane.b32.xlu1 %v77_v37, 264 }
  0xa0   :  { %v187_v40 = vpop.permute.xlu1 %186  ;;  %v176_v41 = vpop.permute.xlu0 %175 }
  0xa1   :  { %v665_v42 = vsub.f32 %v187_v40, %v246_v20  ;;  %v667_v43 = vsub.f32 %v176_v41, %v242_v18 }
  0xa3   :  { %v277_v44 = vand.u32 2147483647, %v665_v42  ;;  %v275_v45 = vand.u32 2147483647, %v667_v43  ;;  %v269_v29 = vmin.f32 %v665_v42, 0.0  ;;  %v267_v30 = vmin.f32 %v667_v43, 0.0 }
  0xa4   :  { %v191_v46 = vpop.permute.xlu1 %190  ;;  %v180_v47 = vpop.permute.xlu0 %179 }
  0xa5   :  { %v285_v48 = vsub.f32 0.0, %v277_v44  ;;  %v283_v49 = vsub.f32 0.0, %v275_v45  ;;  %v671_v50 = vsub.f32 %v191_v46, %v246_v20  ;;  %v673_v51 = vsub.f32 %v180_v47, %v242_v18 }
  0xa7   :  { %v295_v52 = vmul.f32 1.442695, %v285_v48  ;;  %v291_v53 = vmul.f32 1.442695, %v283_v49  ;;  %v278_v54 = vand.u32 2147483647, %v671_v50 }
  0xa8   :  { %v276_v55 = vand.u32 2147483647, %v673_v51  ;;  %v202_v56 = vpop.permute.xlu1 %201  ;;  %v198_v57 = vpop.permute.xlu0 %197 }
  0xa9   :  { %481 = vpow2.f32 %v295_v52  ;;  %v677_v58 = vsub.f32 %v202_v56, %v250_v21  ;;  %v679_v59 = vsub.f32 %v198_v57, %v250_v21  ;;  %v286_v60 = vsub.f32 0.0, %v278_v54 }
  0xaa   :  { %483 = vpow2.f32 %v291_v53  ;;  %v284_v61 = vsub.f32 0.0, %v276_v55 }
  0xab   :  { %v280_v62 = vand.u32 2147483647, %v677_v58  ;;  %v279_v63 = vand.u32 2147483647, %v679_v59  ;;  %v297_v0 = vmul.f32 1.442695, %v286_v60 }
  0xac   :  { %v293_v1 = vmul.f32 1.442695, %v284_v61  ;;  %v213_v2 = vpop.permute.xlu1 %212  ;;  %v209_v3 = vpop.permute.xlu0 %208 }
  0xad   :  { %v288_v4 = vsub.f32 0.0, %v280_v62  ;;  %v287_v5 = vsub.f32 0.0, %v279_v63  ;;  %v683_v6 = vsub.f32 %v213_v2, %v254_v24  ;;  %v685_v7 = vsub.f32 %v209_v3, %v254_v24 }
  0xae   :  { %485 = vpow2.f32 %v297_v0 }
  0xaf   :  { %487 = vpow2.f32 %v293_v1  ;;  %v301_v8 = vmul.f32 1.442695, %v288_v4  ;;  %v299_v9 = vmul.f32 1.442695, %v287_v5  ;;  %v282_v10 = vand.u32 2147483647, %v683_v6 }
  0xb0   :  { %v281_v11 = vand.u32 2147483647, %v685_v7  ;;  %v47_v12 = vpop.permute.xlu0 %46  ;;  %v51_v13 = vpop.permute.xlu1 %50 }
  0xb1   :  { %489 = vpow2.f32 %v301_v8  ;;  %v130_v14 = vsub.f32 %v47_v12, %v113_v31  ;;  %v131_v15 = vsub.f32 %v51_v13, %v113_v31  ;;  %v290_v16 = vsub.f32 0.0, %v282_v10 }
  0xb2   :  { %491 = vpow2.f32 %v299_v9  ;;  %v289_v17 = vsub.f32 0.0, %v281_v11  ;;  %v270_v13 = vmin.f32 %v671_v50, 0.0 }
  0xb3   :  { %v482_v18 = vpop.eup %481  ;;  %v138_v19 = vand.u32 2147483647, %v130_v14  ;;  %vm154_vm1 = vcmp.ge.f32.partialorder %v130_v14, 0.0  ;;  %v139_v20 = vand.u32 2147483647, %v131_v15  ;;  %vm155_vm2 = vcmp.ge.f32.partialorder %v131_v15, 0.0 }
  0xb4   :  { %v484_v21 = vpop.eup %483  ;;  %v309_v22 = vadd.f32 1.0, %v482_v18  ;;  %v305_v23 = vmul.f32 1.442695, %v290_v16  ;;  %v303_v24 = vmul.f32 1.442695, %v289_v17  ;;  %v58_v25 = vpop.permute.xlu0 %57  ;;  %v268_v14 = vmin.f32 %v673_v51, 0.0 }
  0xb5   :  { %v62_v26 = vpop.permute.xlu1 %61  ;;  %v307_v27 = vadd.f32 1.0, %v484_v21  ;;  %vm146_vm3 = vcmp.lt.f32.partialorder %v138_v19, inf  ;;  %vm147_vm4 = vcmp.lt.f32.partialorder %v139_v20, inf  ;;  %v132_v28 = vsub.f32 %v58_v25, %v659_v33 }
  0xb6   :  { %493 = vlog2.f32 %v309_v22  ;;  %vm693_vm5 = vmand %vm146_vm3, %vm154_vm1  ;;  %v133_v32 = vsub.f32 %v62_v26, %v659_v33 }
  0xb7   :  { %495 = vlog2.f32 %v307_v27  ;;  %v463_v35 = vsel %vm693_vm5, 1.0, %v612_v34  ;;  %vm702_vm6 = vmand %vm147_vm4, %vm155_vm2  ;;  %v140_v38 = vand.u32 2147483647, %v132_v28  ;;  %vm156_vm7 = vcmp.ge.f32.partialorder %v132_v28, 0.0 }
  0xb8   :  { %v486_v40 = vpop.eup %485  ;;  %497 = vpow2.f32 %v305_v23  ;;  %v407_v41 = vsel %vm363_vm0, %v463_v35, 0.0  ;;  %v464_v33 = vsel %vm702_vm6, 1.0, %v612_v34  ;;  %v141_v44 = vand.u32 2147483647, %v133_v32  ;;  %v69_v45 = vpop.permute.xlu0 %68 }
  0xb9   :  { %v73_v46 = vpop.permute.xlu1 %72  ;;  %v488_v47 = vpop.eup %487  ;;  %v310_v48 = vadd.f32 1.0, %v486_v40  ;;  %499 = vpow2.f32 %v303_v24  ;;  %v408_v49 = vsel %vm363_vm0, %v464_v33, 0.0  ;;  %vm148_vm8 = vcmp.lt.f32.partialorder %v140_v38, inf }
  0xba   :  { %v308_v52 = vadd.f32 1.0, %v488_v47  ;;  %v409_v53 = vadd.f32 %v408_v49, %v407_v41  ;;  %vm712_vm9 = vmand %vm148_vm8, %vm156_vm7  ;;  %vm149_vm10 = vcmp.lt.f32.partialorder %v141_v44, inf  ;;  %vm157_vm11 = vcmp.ge.f32.partialorder %v133_v32, 0.0 }
  0xbb   :  { %v490_v55 = vpop.eup %489  ;;  %501 = vlog2.f32 %v310_v48  ;;  %v465_v56 = vsel %vm712_vm9, 1.0, %v612_v34  ;;  %vm719_vm12 = vmand %vm149_vm10, %vm157_vm11  ;;  %v134_v60 = vsub.f32 %v69_v45, %v661_v36  ;;  %v135_v61 = vsub.f32 %v73_v46, %v661_v36 }
  0xbc   :  { %v492_v62 = vpop.eup %491  ;;  %503 = vlog2.f32 %v308_v52  ;;  %v312_v63 = vadd.f32 1.0, %v490_v55  ;;  %v410_v0 = vsel %vm363_vm0, %v465_v56, 0.0  ;;  %v466_v1 = vsel %vm719_vm12, 1.0, %v612_v34  ;;  %v80_v2 = vpop.permute.xlu0 %79 }
  0xbd   :  { %v311_v3 = vadd.f32 1.0, %v492_v62  ;;  %v411_v4 = vadd.f32 %v410_v0, %v409_v53  ;;  %v412_v5 = vsel %vm363_vm0, %v466_v1, 0.0  ;;  %v142_v8 = vand.u32 2147483647, %v134_v60  ;;  %v84_v9 = vpop.permute.xlu1 %83 }
  0xbe   :  { %505 = vlog2.f32 %v312_v63  ;;  %vm158_vm13 = vcmp.ge.f32.partialorder %v134_v60, 0.0  ;;  %v143_v10 = vand.u32 2147483647, %v135_v61  ;;  %vm159_vm14 = vcmp.ge.f32.partialorder %v135_v61, 0.0 }
  0xbf   :  { %507 = vlog2.f32 %v311_v3  ;;  %v413_v36 = vadd.f32 %v412_v5, %v411_v4  ;;  %vm150_vm15 = vcmp.lt.f32.partialorder %v142_v8, inf  ;;  %v136_v11 = vsub.f32 %v80_v2, %v663_v39 }
  0xc0   :  { %v494_v12 = vpop.eup %493  ;;  %vm733_vm1 = vmand %vm150_vm15, %vm158_vm13  ;;  %vm151_vm2 = vcmp.lt.f32.partialorder %v143_v10, inf  ;;  %v137_v16 = vsub.f32 %v84_v9, %v663_v39  ;;  %v272_v62 = vmin.f32 %v677_v58, 0.0  ;;  %v271_v2 = vmin.f32 %v679_v59, 0.0 }
  0xc1   :  { %v496_v17 = vpop.eup %495  ;;  %v320_v18 = vmul.f32 0.6931472, %v494_v12  ;;  %v467_v19 = vsel %vm733_vm1, 1.0, %v612_v34  ;;  %vm741_vm3 = vmand %vm151_vm2, %vm159_vm14  ;;  %v144_v50 = vand.u32 2147483647, %v136_v11  ;;  %vm160_vm4 = vcmp.ge.f32.partialorder %v136_v11, 0.0 }
  0xc2   :  { %v498_v51 = vpop.eup %497  ;;  %v316_v21 = vmul.f32 0.6931472, %v496_v17  ;;  %v414_v22 = vsel %vm363_vm0, %v467_v19, 0.0  ;;  %v468_v39 = vsel %vm741_vm3, 1.0, %v612_v34  ;;  %v145_v23 = vand.u32 2147483647, %v137_v16 }
  0xc3   :  { %v500_v24 = vpop.eup %499  ;;  %v333_v25 = vsub.f32 %v269_v29, %v320_v18  ;;  %v314_v26 = vadd.f32 1.0, %v498_v51  ;;  %v415_v27 = vadd.f32 %v414_v22, %v413_v36  ;;  %v416_v28 = vsel %vm363_vm0, %v468_v39, 0.0 }
  0xc4   :  { %v331_v32 = vsub.f32 %v267_v30, %v316_v21  ;;  %v313_v35 = vadd.f32 1.0, %v500_v24  ;;  %vm152_vm7 = vcmp.lt.f32.partialorder %v144_v50, inf  ;;  %vm153_vm8 = vcmp.lt.f32.partialorder %v145_v23, inf }
  0xc5   :  { %v502_v38 = vpop.eup %501  ;;  %v341_v40 = vmax.f32 %v333_v25, -23.02585  ;;  %509 = vlog2.f32 %v314_v26  ;;  %vm755_vm10 = vmand %vm152_vm7, %vm160_vm4  ;;  %vm161_vm11 = vcmp.ge.f32.partialorder %v137_v16, 0.0  ;;  %v417_v42 = vadd.f32 %v416_v28, %v415_v27 }
  0xc6   :  { %v504_v29 = vpop.eup %503  ;;  %v339_v33 = vmax.f32 %v331_v32, -23.02585  ;;  %v322_v44 = vmul.f32 0.6931472, %v502_v38  ;;  %511 = vlog2.f32 %v313_v35  ;;  %v469_v43 = vsel %vm755_vm10, 1.0, %v612_v34  ;;  %vm762_vm13 = vmand %vm153_vm8, %vm161_vm11 }
  0xc7   :  { %v349_v45 = vmul.f32 1.442695, %v341_v40  ;;  %v318_v46 = vmul.f32 0.6931472, %v504_v29  ;;  %v470_v47 = vsel %vm762_vm13, 1.0, %v612_v34  ;;  %v418_v48 = vsel %vm363_vm0, %v469_v43, 0.0 }
  0xc8   :  { %v506_v49 = vpop.eup %505  ;;  %v347_v52 = vmul.f32 1.442695, %v339_v33  ;;  %v334_v53 = vsub.f32 %v270_v13, %v322_v44  ;;  %v419_v55 = vadd.f32 %v418_v48, %v417_v42  ;;  %v420_v56 = vsel %vm363_vm0, %v470_v47, 0.0 }
  0xc9   :  { %v508_v60 = vpop.eup %507  ;;  %v332_v61 = vsub.f32 %v268_v14, %v318_v46  ;;  %v326_v63 = vmul.f32 0.6931472, %v506_v49  ;;  %v357_v0 = vsel %vm712_vm9, %v349_v45, 0.0  ;;  %v274_v59 = vmin.f32 %v683_v6, 0.0 }
  0xca   :  { %v342_v1 = vmax.f32 %v334_v53, -23.02585  ;;  %v324_v34 = vmul.f32 0.6931472, %v508_v60  ;;  %v355_v3 = vsel %vm693_vm5, %v347_v52, 0.0  ;;  %v421_v8 = vadd.f32 %v420_v56, %v419_v55 }
  0xcb   :  { %v340_v4 = vmax.f32 %v332_v61, -23.02585  ;;  %v336_v5 = vsub.f32 %v272_v62, %v326_v63  ;;  %v364_v18 = vsel %vm363_vm0, %v355_v3, 0.0  ;;  %v273_v50 = vmin.f32 %v685_v7, 0.0 }
  0xcc   :  { %v350_v9 = vmul.f32 1.442695, %v342_v1  ;;  %v335_v10 = vsub.f32 %v271_v2, %v324_v34  ;;  %422 = vadd.xlane.f32.xlu1 %v421_v8  ;;  %v367_v6 = vsel %vm363_vm0, %v357_v0, 0.0 }
  0xcd   :  { %v348_v36 = vmul.f32 1.442695, %v340_v4  ;;  %v344_v11 = vmax.f32 %v336_v5, -23.02585 }
  0xce   :  { %v343_v58 = vmax.f32 %v335_v10, -23.02585  ;;  %v358_v54 = vsel %vm719_vm12, %v350_v9, 0.0 }
  0xcf   :  { %v510_v12 = vpop.eup %509  ;;  %v352_v13 = vmul.f32 1.442695, %v344_v11  ;;  %v356_v31 = vsel %vm702_vm6, %v348_v36, 0.0  ;;  %v369_v25 = vsel %vm363_vm0, %v358_v54, 0.0 }
  0xd0   :  { %v512_v14 = vpop.eup %511  ;;  %v351_v16 = vmul.f32 1.442695, %v343_v58  ;;  %v330_v17 = vmul.f32 0.6931472, %v510_v12  ;;  %v365_v19 = vsel %vm363_vm0, %v356_v31, 0.0 }
  0xd1   :  { %v328_v51 = vmul.f32 0.6931472, %v512_v14  ;;  %v366_v21 = vadd.f32 %v365_v19, %v364_v18  ;;  %v360_v57 = vsel %vm741_vm3, %v352_v13, 0.0 }
  0xd2   :  { %v338_v22 = vsub.f32 %v274_v59, %v330_v17  ;;  %v359_v37 = vsel %vm733_vm1, %v351_v16, 0.0  ;;  %v373_v20 = vsel %vm363_vm0, %v360_v57, 0.0 }
  0xd3   :  { %v337_v39 = vsub.f32 %v273_v50, %v328_v51  ;;  %v368_v23 = vadd.f32 %v367_v6, %v366_v21  ;;  %v371_v7 = vsel %vm363_vm0, %v359_v37, 0.0 }
  0xd4   :  { %v346_v24 = vmax.f32 %v338_v22, -23.02585 }
  0xd5   :  { %v345_v26 = vmax.f32 %v337_v39, -23.02585  ;;  %v370_v27 = vadd.f32 %v369_v25, %v368_v23 }
  0xd6   :  { %v354_v28 = vmul.f32 1.442695, %v346_v24 }
  0xd7   :  { %v353_v32 = vmul.f32 1.442695, %v345_v26  ;;  %v372_v35 = vadd.f32 %v371_v7, %v370_v27 }
  0xd8   :  { %v362_v38 = vsel %vm762_vm13, %v354_v28, 0.0 }
  0xd9   :  { %v361_v15 = vsel %vm755_vm10, %v353_v32, 0.0  ;;  %v374_v40 = vadd.f32 %v373_v20, %v372_v35  ;;  %v377_v33 = vsel %vm363_vm0, %v362_v38, 0.0 }
  0xda   :  { %v375_v42 = vsel %vm363_vm0, %v361_v15, 0.0  ;;  %vm389_vm0 = vcmask 0  }
  0xdb   :  { %v376_v29 = vadd.f32 %v375_v42, %v374_v40 }
  0xdd   :  { %v378_v44 = vadd.f32 %v377_v33, %v376_v29 }
  0xdf   :  { %379 = vadd.xlane.f32.xlu0 %v378_v44 }
 0x159   :  { %v423_v43 = vpop.xlane.xlu1 %422 }
 0x15a   :  { %v424_v45 = vrot.slane %v423_v43, 4 }
 0x15c   :  { %v425_v46 = vadd.f32 %v424_v45, %v423_v43 }
 0x15e   :  { %v426_v47 = vrot.slane %v425_v46, 2 }
 0x160   :  { %v427_v30 = vadd.f32 %v426_v47, %v425_v46 }
 0x162   :  { %v428_v41 = vrot.slane %v427_v30, 1 }
 0x164   :  { %v429_v61 = vadd.f32 %v428_v41, %v427_v30 }
 0x16c   :  { %v380_v48 = vpop.xlane.xlu0 %379 }
 0x16d   :  { %v381_v49 = vrot.slane %v380_v48, 4 }
 0x16f   :  { %v382_v52 = vadd.f32 %v381_v49, %v380_v48 }
 0x171   :  { %v383_v53 = vrot.slane %v382_v52, 2 }
 0x173   :  { %v384_v55 = vadd.f32 %v383_v53, %v382_v52 }
 0x175   :  { %v385_v56 = vrot.slane %v384_v55, 1 }
 0x177   :  { %v386_v60 = vadd.f32 %v385_v56, %v384_v55 }
 0x179   :  { %471 = vpush %v386_v60 }
 0x17a   :  { %473 = vpush %v429_v61 }
 0x1aa   :  { %s472_s11 = spop %471 }
 0x1ab   :  { %v388_v62 = vstv %s472_s11  ;;  %s474_s12 = spop %473 }
 0x1ac   :  { %v431_v63 = vstv %s474_s12  ;;  %390 = vst.msk [vmem:[#allocation7] sm:$0x1] %vm389_vm0, %v388_v62 }
 0x1ad   :  { %568 = shalt.err (!%p565_p6)
}
 0x1ae   :  { %s569_s17 = scalar_lea.hbm %s835_s2, 16 }
 0x1af   :  { %p570_p7 = scmp.ne.s32.totalorder %s835_s2, %s569_s17  ;;  %p573_p8 = scmp.lt.u32.totalorder %s569_s17, %s835_s2 }
 0x1b1   :  { %p575_p9 = pnand %p573_p8, %p570_p7 }
 0x1b3   :  { %578 = shalt.err (!%p575_p9)
}
 0x1b4   :  { %442 = dma.vmem_to_hbm [thread:$0]  %s440_s8, 16, %s835_s2, [#allocation4]   ;;  %432 = vst.msk [vmem:[#allocation8] sm:$0x1] %vm389_vm0, %v431_v63 }
 0x1b5   :  { %s579_s24 = scalar_lea.vmem %s799_s10, 16  ;;  %s583_s25 = scalar_lea.vmem %s799_s10, 32 }
 0x1b6   :  { %p580_p10 = scmp.ne.s32.totalorder %s799_s10, %s579_s24  ;;  %p584_p11 = scmp.lt.s32.totalorder %s799_s10, %s799_s10 }
 0x1b7   :  { %p585_p12 = scmp.lt.s32.totalorder %s583_s25, %s579_s24 }
 0x1b9   :  { %p586_p13 = por %p585_p12, %p584_p11 }
 0x1bb   :  { %p587_p0 = pnand %p586_p13, %p580_p10 }
 0x1bd   :  { %590 = shalt.err (!%p587_p0)
}
 0x1be   :  { %s591_s28 = scalar_lea.hbm %s836_s3, 16 }
 0x1bf   :  { %p592_p1 = scmp.ne.s32.totalorder %s836_s3, %s591_s28  ;;  %p595_p2 = scmp.lt.u32.totalorder %s591_s28, %s836_s3 }
 0x1c1   :  { %p597_p3 = pnand %p595_p2, %p592_p1 }
 0x1c3   :  { %600 = shalt.err (!%p597_p3)
}
 0x1c4   :  { %452 = dma.vmem_to_hbm [thread:$0]  %s799_s10, 16, %s836_s3, [#allocation9]  }
 0x1c5   :  { %605 = dma.done.wait [#allocation4], 16  }
 0x1c6   :  { %606 = vsyncadd [#allocation4], 4294967280 }
 0x1c7   :  { %607 = dma.done.wait [#allocation9], 16  }
 0x1c8   :  { %608 = vsyncadd [#allocation9], 4294967280 }
 0x1c9   :  { %459 = vsyncpa [#allocation3], 1 }
 0x1ca   :  { %460 = vsyncpa [#allocation6], 1 }
 0x1cb   :  { %461 = vsyncpa [#allocation4], 1 }
 0x1cc   :  { %462 = vsyncpa [#allocation9], 1 }

</bundles_post_ra>
